<compile_context>
chip_gen: v7x
topology: tpu7x:2x2x1
jax: 0.10.0
libtpu: 0.0.40
codegen_flags: <defaults>
</compile_context>

<pallas_src>
import functools
import math

import jax
import jax.numpy as jnp
from jax.experimental import pallas as pl
from jax.experimental.pallas import tpu as pltpu


def _round_up(x: int, m: int) -> int:
    return ((x + m - 1) // m) * m


# ----------------------------------------------------------------------------
# Kernels (grid = (batch_tiles,); all weights VMEM-resident)
# ----------------------------------------------------------------------------
def _head_only_kernel(cls_ref, w_ref, b_ref, o_ref):
    """o = cls @ W + b   (W is bf16, (H, C_pad), lane-dense; f32 accumulation)."""
    acc = jnp.dot(cls_ref[...].astype(jnp.bfloat16), w_ref[...],
                  preferred_element_type=jnp.float32)
    o_ref[...] = (acc + b_ref[...]).astype(o_ref.dtype)


def _prelogits_head_kernel(cls_ref, w1_ref, b1_ref, w2_ref, b2_ref, o_ref):
    """o = tanh(cls @ W1 + b1) @ W2 + b2, fully fused per batch tile.

    W1/W2 are bf16 and VMEM-resident; accumulation is f32.  The tanh activation is
    kept in f32 for the second matmul (cast W2 up) so the output matches the f32
    reference tightly; cast it to bf16 instead if pure throughput matters more.
    """
    pre = jnp.dot(cls_ref[...].astype(jnp.bfloat16), w1_ref[...],
                  preferred_element_type=jnp.float32)
    act = jnp.tanh(pre + b1_ref[...])
    acc = jnp.dot(act, w2_ref[...].astype(jnp.float32),
                  preferred_element_type=jnp.float32)
    o_ref[...] = (acc + b2_ref[...]).astype(o_ref.dtype)


# ----------------------------------------------------------------------------
# One-time parameter preparation (hoisted out of the per-call forward)
# ----------------------------------------------------------------------------
def prepare_params(params, *, hidden_dim, num_classes, representation_size,
                   weight_dtype=jnp.bfloat16):
    """Transpose PyTorch (out, in) weights to MXU-ready (in, out), zero-pad to tile
    multiples, and cast to bf16 — once, at parameter-load time."""
    C_pad = _round_up(num_classes, 128)

    def w_prep(w_out_in, in_dim, out_dim):
        w = jnp.transpose(w_out_in).astype(weight_dtype)
        return jnp.pad(w, ((0, in_dim - w.shape[0]), (0, out_dim - w.shape[1])))

    def b_prep(b, out_dim):
        b = b.reshape(1, -1).astype(jnp.float32)
        return jnp.pad(b, ((0, 0), (0, out_dim - b.shape[1])))

    prepared = {}
    if representation_size is not None:
        R_pad = _round_up(representation_size, 128)
        prepared["pre_w"] = w_prep(params["pre_w"], hidden_dim, R_pad)    # (H, R_pad)
        prepared["pre_b"] = b_prep(params["pre_b"], R_pad)                # (1, R_pad)
        prepared["head_w"] = w_prep(params["head_w"], R_pad, C_pad)       # (R_pad, C_pad)
    else:
        prepared["head_w"] = w_prep(params["head_w"], hidden_dim, C_pad)  # (H, C_pad)
    prepared["head_b"] = b_prep(params["head_b"], C_pad)                  # (1, C_pad)
    return prepared


# ----------------------------------------------------------------------------
# Forward wrapper
# ----------------------------------------------------------------------------
@functools.partial(jax.jit, static_argnames=("num_classes", "has_prelogits"))
def vit_heads_forward(x, prepared, *, num_classes, has_prelogits):
    """Pallas implementation of ViTHeads.forward.

    x:        (B, S, H) float32
    prepared: output of prepare_params() (bf16 (in, out) weights, f32 biases, padded).
    """
    B, _, H = x.shape
    dtype = x.dtype

    # Only the CLS token is used: slice BEFORE the kernel so only (B, H) is DMA'd.
    cls = x[:, 0, :]

    # Batch tiling: 8-aligned; >=2 parallel tiles when B > 8 (v7x has 2 TensorCores);
    # tile grows to 256 for large B (v6e/v7x 256x256 MXU).
    if B <= 8:
        tm = _round_up(max(B, 1), 8)
    else:
        tm = min(256, _round_up(-(-B // 2), 8))
    B_pad = _round_up(B, tm)
    if B_pad != B:
        cls = jnp.pad(cls, ((0, B_pad - B), (0, 0)))

    grid = (B_pad // tm,)
    C_pad = prepared["head_w"].shape[1]

    cls_spec = pl.BlockSpec((tm, H), lambda i: (i, 0))
    out_spec = pl.BlockSpec((tm, C_pad), lambda i: (i, 0))
    out_shape = jax.ShapeDtypeStruct((B_pad, C_pad), dtype)

    def resident(shape):
        # Constant block index: fetched once, stays VMEM-resident across batch tiles.
        return pl.BlockSpec(shape, lambda i: (0, 0))

    compiler_params = pltpu.CompilerParams(
        dimension_semantics=("parallel",),
        vmem_limit_bytes=32 * 1024 * 1024)

    if has_prelogits:
        w1, b1 = prepared["pre_w"], prepared["pre_b"]
        w2, b2 = prepared["head_w"], prepared["head_b"]
        R_pad = w1.shape[1]
        cost = pl.CostEstimate(
            flops=2 * B_pad * (H * R_pad + R_pad * C_pad),
            transcendentals=B_pad * R_pad,
            bytes_accessed=(4 * B_pad * H                      # cls (f32)
                            + 2 * (H * R_pad + R_pad * C_pad)  # bf16 weights, fetched once
                            + 4 * (R_pad + C_pad)              # f32 biases
                            + 4 * B_pad * C_pad),              # output (f32)
        )
        out = pl.pallas_call(
            _prelogits_head_kernel,
            out_shape=out_shape,
            grid=grid,
            in_specs=[
                cls_spec,
                resident((H, R_pad)),
                resident((1, R_pad)),
                resident((R_pad, C_pad)),
                resident((1, C_pad)),
            ],
            out_specs=out_spec,
            compiler_params=compiler_params,
            cost_estimate=cost,
        )(cls, w1, b1, w2, b2)
    else:
        w, b = prepared["head_w"], prepared["head_b"]
        cost = pl.CostEstimate(
            flops=2 * B_pad * H * C_pad,
            transcendentals=0,
            bytes_accessed=(4 * B_pad * H + 2 * H * C_pad
                            + 4 * C_pad + 4 * B_pad * C_pad),
        )
        out = pl.pallas_call(
            _head_only_kernel,
            out_shape=out_shape,
            grid=grid,
            in_specs=[cls_spec, resident((H, C_pad)), resident((1, C_pad))],
            out_specs=out_spec,
            compiler_params=compiler_params,
            cost_estimate=cost,
        )(cls, w, b)

    # Strip batch / class padding.
    return out[:B, :num_classes]


# ----------------------------------------------------------------------------
# Parameter construction (deterministic; shapes follow ViTHeads.__init__)
# ----------------------------------------------------------------------------
def make_params(key, hidden_dim, num_classes, representation_size):
    """Linear weights in the PyTorch (out, in) convention.

    The PyTorch module zero-initializes the 'head' Linear, which would make the
    forward trivially zero; we keep the shapes but draw small random values so
    the correctness check is non-trivial.
    """
    params = {}
    if representation_size is not None:
        k1, k2, key = jax.random.split(key, 3)
        std = math.sqrt(1.0 / hidden_dim)
        params["pre_w"] = (
            jax.random.truncated_normal(
                k1, -2.0, 2.0, (representation_size, hidden_dim), jnp.float32) * std)
        params["pre_b"] = jnp.zeros((1, representation_size), jnp.float32)
        head_in = representation_size
        kh = k2
    else:
        kh, key = jax.random.split(key)
        head_in = hidden_dim
    params["head_w"] = 0.02 * jax.random.normal(kh, (num_classes, head_in), jnp.float32)
    params["head_b"] = 0.01 * jnp.ones((1, num_classes), jnp.float32)
    return params


def reference_forward(x, params, has_prelogits):
    """Pure-JAX reference mirroring the kernel numerics (bf16 weights, f32 accumulation)."""
    cls = x[:, 0].astype(jnp.bfloat16)
    if has_prelogits:
        w1 = params["pre_w"].T.astype(jnp.bfloat16)
        pre = jnp.dot(cls, w1, preferred_element_type=jnp.float32) + params["pre_b"]
        act = jnp.tanh(pre)
        w2 = params["head_w"].T.astype(jnp.bfloat16).astype(jnp.float32)
        return jnp.dot(act, w2, preferred_element_type=jnp.float32) + params["head_b"]
    w = params["head_w"].T.astype(jnp.bfloat16)
    return jnp.dot(cls, w, preferred_element_type=jnp.float32) + params["head_b"]


# ----------------------------------------------------------------------------
# Main
# ----------------------------------------------------------------------------
if __name__ == "__main__":
    B, S, H = 2, 8, 32           # batch, tokens (incl. CLS), hidden_dim
    R, C = 32, 16                # representation_size, num_classes

    key = jax.random.PRNGKey(0)
    kx, kp1, kp2 = jax.random.split(key, 3)
    x = jax.random.normal(kx, (B, S, H), jnp.float32)

    # Tolerance: reference uses the same bf16-rounded weights, so the only differences
    # are f32 summation order / EUP-tanh lowering — well inside 1e-4.
    ATOL = RTOL = 1e-4

    # Path 1: representation_size = R  (pre_logits -> tanh -> head)
    params1 = make_params(kp1, H, C, R)
    prep1 = prepare_params(params1, hidden_dim=H, num_classes=C, representation_size=R)
    out1 = vit_heads_forward(x, prep1, num_classes=C, has_prelogits=True)
    out1 = jax.block_until_ready(out1)
    ref1 = reference_forward(x, params1, True)
    assert out1.shape == (B, C)
    assert jnp.allclose(out1, ref1, atol=ATOL, rtol=RTOL), "prelogits path mismatch"

    # Path 2: representation_size = None  (single head Linear)
    params2 = make_params(kp2, H, C, None)
    prep2 = prepare_params(params2, hidden_dim=H, num_classes=C, representation_size=None)
    out2 = vit_heads_forward(x, prep2, num_classes=C, has_prelogits=False)
    out2 = jax.block_until_ready(out2)
    ref2 = reference_forward(x, params2, False)
    assert out2.shape == (B, C)
    assert jnp.allclose(out2, ref2, atol=ATOL, rtol=RTOL), "head-only path mismatch"

    print("KERNEL_OK")
</pallas_src>

<mosaic_0001>
module attributes {stable_mosaic.version = 11 : i64} {
  func.func @_prelogits_head_kernel(%arg0: i32, %arg1: memref<8x32xf32, #tpu.memory_space<vmem>>, %arg2: memref<32x128xbf16, #tpu.memory_space<vmem>>, %arg3: memref<1x128xf32, #tpu.memory_space<vmem>>, %arg4: memref<128x128xbf16, #tpu.memory_space<vmem>>, %arg5: memref<1x128xf32, #tpu.memory_space<vmem>>, %arg6: memref<8x128xf32, #tpu.memory_space<vmem>>) attributes {dimension_semantics = [#tpu.dimension_semantics<parallel>], iteration_bounds = array<i64: 1>, scalar_prefetch = 0 : i64, scratch_operands = 0 : i64, tpu.core_type = #tpu.core_type<tc>, window_params = [{transform_indices = @transform_0, window_bounds = array<i64: 8, 32>}, {pipeline_mode = #tpu.pipeline_mode<synchronous>, transform_indices = @transform_1, window_bounds = array<i64: 32, 128>}, {pipeline_mode = #tpu.pipeline_mode<synchronous>, transform_indices = @transform_2, window_bounds = array<i64: 1, 128>}, {pipeline_mode = #tpu.pipeline_mode<synchronous>, transform_indices = @transform_3, window_bounds = array<i64: 128, 128>}, {pipeline_mode = #tpu.pipeline_mode<synchronous>, transform_indices = @transform_4, window_bounds = array<i64: 1, 128>}, {transform_indices = @transform_5, window_bounds = array<i64: 8, 128>}]} {
    %c0 = arith.constant 0 : index
    %c0_0 = arith.constant 0 : index
    %0 = vector.load %arg1[%c0, %c0_0] : memref<8x32xf32, #tpu.memory_space<vmem>>, vector<8x32xf32>
    %1 = arith.truncf %0 : vector<8x32xf32> to vector<8x32xbf16>
    %c0_1 = arith.constant 0 : index
    %c0_2 = arith.constant 0 : index
    %2 = vector.load %arg2[%c0_1, %c0_2] : memref<32x128xbf16, #tpu.memory_space<vmem>>, vector<32x128xbf16>
    %cst = arith.constant dense<0.000000e+00> : vector<8x128xf32>
    %3 = tpu.matmul %1, %2, %cst {dimension_numbers = #tpu.dot_dimension_numbers<[1], [0], [0], [1], [0, 0, 1, 1], [], []>} : vector<8x32xbf16>, vector<32x128xbf16>, vector<8x128xf32> -> vector<8x128xf32>
    %c0_3 = arith.constant 0 : index
    %c0_4 = arith.constant 0 : index
    %4 = vector.load %arg3[%c0_3, %c0_4] : memref<1x128xf32, #tpu.memory_space<vmem>>, vector<1x128xf32>
    %5 = vector.broadcast %4 : vector<1x128xf32> to vector<8x128xf32>
    %6 = arith.addf %3, %5 : vector<8x128xf32>
    %7 = math.tanh %6 : vector<8x128xf32>
    %c0_5 = arith.constant 0 : index
    %c0_6 = arith.constant 0 : index
    %8 = vector.load %arg4[%c0_5, %c0_6] : memref<128x128xbf16, #tpu.memory_space<vmem>>, vector<128x128xbf16>
    %9 = arith.extf %8 : vector<128x128xbf16> to vector<128x128xf32>
    %cst_7 = arith.constant dense<0.000000e+00> : vector<8x128xf32>
    %10 = tpu.matmul %7, %9, %cst_7 {dimension_numbers = #tpu.dot_dimension_numbers<[1], [0], [0], [1], [0, 0, 1, 1], [], []>} : vector<8x128xf32>, vector<128x128xf32>, vector<8x128xf32> -> vector<8x128xf32>
    %c0_8 = arith.constant 0 : index
    %c0_9 = arith.constant 0 : index
    %11 = vector.load %arg5[%c0_8, %c0_9] : memref<1x128xf32, #tpu.memory_space<vmem>>, vector<1x128xf32>
    %12 = vector.broadcast %11 : vector<1x128xf32> to vector<8x128xf32>
    %13 = arith.addf %10, %12 : vector<8x128xf32>
    %c0_10 = arith.constant 0 : index
    %c0_11 = arith.constant 0 : index
    %14 = vector.load %arg6[%c0_10, %c0_11] : memref<8x128xf32, #tpu.memory_space<vmem>>, vector<8x128xf32>
    tpu.vector_store %arg6[%c0_10, %c0_11], %13 {strides = array<i32>} : memref<8x128xf32, #tpu.memory_space<vmem>>, vector<8x128xf32>,
    return
  }
  func.func @transform_0(%arg0: i32) -> (i32, i32) {
    %c0_i32 = arith.constant 0 : i32
    %c0_i32_0 = arith.constant 0 : i32
    return %arg0, %c0_i32 : i32, i32
  }
  func.func @transform_1(%arg0: i32) -> (i32, i32) {
    %c0_i32 = arith.constant 0 : i32
    %c0_i32_0 = arith.constant 0 : i32
    %c0_i32_1 = arith.constant 0 : i32
    return %c0_i32, %c0_i32_0 : i32, i32
  }
  func.func @transform_2(%arg0: i32) -> (i32, i32) {
    %c0_i32 = arith.constant 0 : i32
    %c0_i32_0 = arith.constant 0 : i32
    %c0_i32_1 = arith.constant 0 : i32
    return %c0_i32, %c0_i32_0 : i32, i32
  }
  func.func @transform_3(%arg0: i32) -> (i32, i32) {
    %c0_i32 = arith.constant 0 : i32
    %c0_i32_0 = arith.constant 0 : i32
    %c0_i32_1 = arith.constant 0 : i32
    return %c0_i32, %c0_i32_0 : i32, i32
  }
  func.func @transform_4(%arg0: i32) -> (i32, i32) {
    %c0_i32 = arith.constant 0 : i32
    %c0_i32_0 = arith.constant 0 : i32
    %c0_i32_1 = arith.constant 0 : i32
    return %c0_i32, %c0_i32_0 : i32, i32
  }
  func.func @transform_5(%arg0: i32) -> (i32, i32) {
    %c0_i32 = arith.constant 0 : i32
    %c0_i32_0 = arith.constant 0 : i32
    return %arg0, %c0_i32 : i32, i32
  }
}

</mosaic_0001>

<bundles_post_ra>
// kernel: vit_heads_forward.1
= control target key start
LH: loop header
LB: loop body
LE: loop exit
PB: predicated region body
PF: predicated region fallthrough
CT: control target
= control target key end

     0   :  { %10 = vsyncpa [#allocation3], 0  ;;  %s385_s18 = smov [#allocation2]   ;;  %s451_s0 = inlined_call_operand.vmem [shape: f32[8,32], index: 0, kind: input, shape index: {}]   ;;  %s452_s1 = inlined_call_operand.vmem [shape: bf16[32,128], index: 1, kind: input, shape index: {}]   ;;  %s453_s2 = inlined_call_operand.vmem [shape: f32[1,128], index: 2, kind: input, shape index: {}]   ;;  %s454_s3 = inlined_call_operand.hbm [shape: bf16[128,128], index: 3, kind: input, shape index: {}]   ;;  %s455_s4 = inlined_call_operand.vmem [shape: f32[1,128], index: 4, kind: input, shape index: {}]   ;;  %s456_s5 = inlined_call_operand.vmem [shape: f32[8,128], index: 5, kind: output, shape index: {}]  }
   0x1   :  { %s22_s19 = sshll.u32 %s385_s18, 4  ;;  %s361_s22 = scalar_lea.hbm %s454_s3, 1024  ;;  %s23_s19 = int_to_ptr.vmem [resolvable:$true] %s22_s19 }
   0x2   :  { %p362_p0 = scmp.ne.s32.totalorder %s454_s3, %s361_s22  ;;  %p365_p1 = scmp.lt.u32.totalorder %s361_s22, %s454_s3 }
   0x4   :  { %p367_p2 = pnand %p365_p1, %p362_p0 }
   0x6   :  { %370 = shalt.err (!%p367_p2)
}
   0x7   :  { %s371_s27 = scalar_lea.vmem %s23_s19, 1024  ;;  %p376_p4 = scmp.lt.s32.totalorder %s23_s19, %s23_s19 }
   0x8   :  { %p372_p3 = scmp.ne.s32.totalorder %s23_s19, %s371_s27  ;;  %p377_p5 = scmp.lt.s32.totalorder %s371_s27, %s371_s27 }
   0xa   :  { %p378_p6 = por %p377_p5, %p376_p4 }
   0xc   :  { %p379_p7 = pnand %p378_p6, %p372_p3 }
   0xe   :  { %382 = shalt.err (!%p379_p7)
}
   0xf   :  { %s386_s28 = smov 64   ;;  %s387_s29 = smov 4  }
  0x10   :  { %28 = dma.hbm_to_vmem [thread:$0]  %s454_s3, 1024, %s23_s19, [#allocation3], %s386_s28, %s386_s28, %s387_s29  }
  0x11   :  { %383 = dma.done.wait [#allocation3], 1024  }
  0x12   :  { %384 = vsyncadd [#allocation3], 4294966272  ;;  %v388_v0 = vmov 0.0   ;;  %vm389_vm0 = vmmov 0   ;;  %v390_v1 = vmov 0.0|0.0   ;;  %v357_v2 = vld [vmem:[%s452_s1] sm:$0xff]  }
  0x13   :  { %284 = vmatprep.subr.bf16.mxu0 %v388_v0  ;;  %288 = vmatprep.mubr.msk.bf16.mxu0 %vm389_vm0, %v388_v0  ;;  %v358_v3 = vld [vmem:[%s452_s1 + $0x8] sm:$0xff]   ;;  %v35_v4 = vld [vmem:[%s451_s0] sm:$0xff]  ;;  %vm60_vm1 = vcmask 261120   ;;  %v258_v8 = vld [vmem:[#allocation2 + $0x10] sm:$0xff]  }
  0x14   :  { %327 = vmatprep.subr.bf16.mxu1 %v390_v1  ;;  %324 = vmatprep.mubr.msk.f32.mxu1 %vm389_vm0, %v388_v0  ;;  %v226_v5 = vld [vmem:[#allocation2] sm:$0xff]   ;;  %v257_v6 = vld [vmem:[#allocation2 + $0x8] sm:$0xff]   ;;  %v36_v7 = vpack.c.bf16 %v35_v4, %v35_v4  ;;  %v259_v9 = vld [vmem:[#allocation2 + $0x18] sm:$0xff]  }
  0x15   :  { %285 = vmatpush3.bf16.msra.mxu0 %v357_v2  ;;  %329 = vmatpush3.bf16.msra.mxu1 %v226_v5  ;;  %v260_v10 = vld [vmem:[#allocation2 + $0x20] sm:$0xff]   ;;  %v261_v11 = vld [vmem:[#allocation2 + $0x28] sm:$0xff]   ;;  %v262_v12 = vld [vmem:[#allocation2 + $0x30] sm:$0xff]  }
  0x16   :  { %286 = vmatprep.subr.bf16.mxu0 %v388_v0  ;;  %330 = vmatprep.subr.bf16.mxu1 %v390_v1  ;;  %v263_v13 = vld [vmem:[#allocation2 + $0x38] sm:$0xff]   ;;  %v220_v14 = vld [vmem:[%s453_s2] ss:$0 sm:$0xff] }
  0x17   :  { %v224_v21 = vld [vmem:[%s455_s4] ss:$0 sm:$0xff] }
  0x19   :  { %287 = vmatpush3.bf16.msra.mxu0 %v358_v3  ;;  %332 = vmatpush3.bf16.msra.mxu1 %v257_v6 }
  0x1a   :  { %333 = vmatprep.subr.bf16.mxu1 %v390_v1 }
  0x1c   :  { %289 = vmatmul.mubr.msk.bf16.vlgmr.msra.gmra.mrb[0].mxu0 %vm60_vm1, %v36_v7 }
  0x1d   :  { %335 = vmatpush3.bf16.msra.mxu1 %v258_v8 }
  0x1e   :  { %336 = vmatprep.subr.bf16.mxu1 %v390_v1 }
  0x21   :  { %338 = vmatpush3.bf16.msra.mxu1 %v259_v9 }
  0x22   :  { %339 = vmatprep.subr.bf16.mxu1 %v390_v1 }
  0x25   :  { %341 = vmatpush3.bf16.msra.mxu1 %v260_v10 }
  0x26   :  { %342 = vmatprep.subr.bf16.mxu1 %v390_v1 }
  0x29   :  { %344 = vmatpush3.bf16.msra.mxu1 %v261_v11 }
  0x2a   :  { %345 = vmatprep.subr.bf16.mxu1 %v390_v1 }
  0x2d   :  { %347 = vmatpush3.bf16.msra.mxu1 %v262_v12 }
  0x2e   :  { %348 = vmatprep.subr.bf16.mxu1 %v390_v1 }
  0x31   :  { %350 = vmatpush3.bf16.msra.mxu1 %v263_v13 }
  0xef   :  { %v98_v15 = vpop.f32.mrb[0].mxu0 }
  0xf0   :  { %v99_v16 = vadd.f32 %v220_v14, %v98_v15  ;;  %v290_v17 = vpop.f32.mrb[1].mxu0 }
  0xf1   :  { %v101_v18 = vpop.f32.mrb[2].mxu0 }
  0xf2   :  { %359 = vtanh.f32 %v99_v16  ;;  %v291_v19 = vpop.f32.mrb[3].mxu0 }
  0xfc   :  { %v360_v20 = vpop.eup %359 }
  0xfd   :  { %325 = vmatmul.mubr.f32.vlgmr.msra.gmra.mrb[0].mxu1 %v360_v20 }
 0x1d0   :  { %v210_v22 = vpop.f32.mrb[0].mxu1 }
 0x1d1   :  { %v211_v23 = vadd.f32 %v224_v21, %v210_v22  ;;  %v326_v24 = vpop.f32.mrb[1].mxu1 }
 0x1d3   :  { %214 = vst [vmem:[%s456_s5] sm:$0xff] %v211_v23 }
 0x1d4   :  { %219 = vsyncpa [#allocation3], 1 }

</bundles_post_ra>
